<compile_context>
chip_gen: v6e
topology: v6e:2x2x1
jax: 0.10.0
libtpu: 0.0.40
codegen_flags: <defaults>
</compile_context>

<pallas_src>
import functools
import math

import jax
import jax.numpy as jnp
import numpy as np
from jax.experimental import pallas as pl
from jax.experimental.pallas import tpu as pltpu

EXPANSION = 4          # Bottleneck.expansion
BN_EPS = 1e-5
LANE = 128


def _round_up(x, m):
    return (x + m - 1) // m * m


@functools.lru_cache(maxsize=None)
def _vmem_limit():
    # ~75% of physical VMEM, capped at 96 MiB (v5e/v6e: 96 MiB, v7x: 48 MiB).
    try:
        cap = pltpu.get_tpu_info().vmem_capacity_bytes
        return int(min(cap * 3 // 4, 96 * 1024 * 1024))
    except Exception:
        return 48 * 1024 * 1024


# ----------------------------- Pallas kernels -----------------------------

def _mm_kernel(x_ref, w_ref, b_ref, o_ref, acc_ref, *, relu):
    # grid = (m_tiles, k_tiles); K axis last & "arbitrary"; acc is f32 VMEM scratch.
    @pl.when(pl.program_id(1) == 0)
    def _init():
        acc_ref[...] = jnp.zeros_like(acc_ref)

    acc_ref[...] += jnp.dot(x_ref[...], w_ref[...], preferred_element_type=jnp.float32)

    @pl.when(pl.program_id(1) == pl.num_programs(1) - 1)
    def _fin():
        out = acc_ref[...] + b_ref[...]
        if relu:
            out = jnp.maximum(out, 0.0)
        o_ref[...] = out.astype(o_ref.dtype)


def _mm_res_kernel(x_ref, w_ref, b_ref, r_ref, o_ref, acc_ref, *, relu):
    @pl.when(pl.program_id(1) == 0)
    def _init():
        acc_ref[...] = jnp.zeros_like(acc_ref)

    acc_ref[...] += jnp.dot(x_ref[...], w_ref[...], preferred_element_type=jnp.float32)

    @pl.when(pl.program_id(1) == pl.num_programs(1) - 1)
    def _fin():
        out = acc_ref[...] + b_ref[...] + r_ref[...].astype(jnp.float32)
        if relu:
            out = jnp.maximum(out, 0.0)
        o_ref[...] = out.astype(o_ref.dtype)


def _conv3x3_kernel(ph_ref, w_ref, b_ref, o_ref, acc_ref, *, taps, m_rows, relu):
    # ph_ref: (n_phase, m_rows + pad, Kp) bf16  -- row-flattened (full-geometry) phases
    # w_ref : (9, Kp, Np) bf16 (BN folded), b_ref: (1, Np) f32
    # For tap t, the contribution is a shifted row-window of one phase times w[t].
    acc_ref[...] = jnp.zeros_like(acc_ref)
    for t, (pidx, off) in enumerate(taps):
        xs = ph_ref[pidx, pl.ds(off, m_rows), :]
        acc_ref[...] += jnp.dot(xs, w_ref[t], preferred_element_type=jnp.float32)
    out = acc_ref[...] + b_ref[...]
    if relu:
        out = jnp.maximum(out, 0.0)
    o_ref[...] = out.astype(o_ref.dtype)


def _pool_fc_kernel(p_ref, x_ref, w_ref, b_ref, o_ref, *, inv_hw):
    # pooling as a ones-matrix matmul on the MXU, fused with the fc matmul.
    pooled = jnp.dot(p_ref[...], x_ref[...], preferred_element_type=jnp.float32) * inv_hw
    logits = jnp.dot(pooled.astype(w_ref.dtype), w_ref[...],
                     preferred_element_type=jnp.float32) + b_ref[...]
    o_ref[...] = logits


# ----------------------------- Kernel wrappers -----------------------------

def fused_matmul(x, w, b, *, relu=False, residual=None, use_pallas=True):
    """y = [relu]((x @ w) + b (+ residual));  x:(M,Kp) bf16, w:(Kp,Np) bf16, b:(1,Np) f32."""
    M, Kp = x.shape
    Np = w.shape[1]
    if not use_pallas:  # pure-JAX reference with identical numerics (bf16 in, f32 acc)
        out = jnp.dot(x, w, preferred_element_type=jnp.float32) + b
        if residual is not None:
            out = out + residual.astype(jnp.float32)
        if relu:
            out = jnp.maximum(out, 0.0)
        return out.astype(jnp.bfloat16)

    # Row tiling: small M -> one full-row block (no pad copy); big M -> pad to TM multiple.
    if M <= 1024:
        TM, Mp = M, M
        xp, rp = x, residual
    else:
        TM = 512
        Mp = _round_up(M, TM)
        xp = jnp.zeros((Mp, Kp), x.dtype).at[:M].set(x)
        rp = None if residual is None else \
            jnp.zeros((Mp, Np), residual.dtype).at[:M].set(residual)

    TK = 512 if (Kp > 512 and Kp % 512 == 0) else Kp
    grid = (Mp // TM, Kp // TK)

    x_spec = pl.BlockSpec((TM, TK), lambda i, k: (i, k))
    w_spec = pl.BlockSpec((TK, Np), lambda i, k: (k, 0))
    b_spec = pl.BlockSpec((1, Np), lambda i, k: (0, 0))
    o_spec = pl.BlockSpec((TM, Np), lambda i, k: (i, 0))
    cparams = pltpu.CompilerParams(
        dimension_semantics=("parallel", "arbitrary"),
        vmem_limit_bytes=_vmem_limit())
    out_shape = jax.ShapeDtypeStruct((Mp, Np), jnp.bfloat16)
    scratch = [pltpu.VMEM((TM, Np), jnp.float32)]

    if residual is None:
        out = pl.pallas_call(
            functools.partial(_mm_kernel, relu=relu),
            grid=grid,
            in_specs=[x_spec, w_spec, b_spec],
            out_specs=o_spec,
            out_shape=out_shape,
            scratch_shapes=scratch,
            compiler_params=cparams,
        )(xp, w, b)
    else:
        r_spec = pl.BlockSpec((TM, Np), lambda i, k: (i, 0))
        out = pl.pallas_call(
            functools.partial(_mm_res_kernel, relu=relu),
            grid=grid,
            in_specs=[x_spec, w_spec, b_spec, r_spec],
            out_specs=o_spec,
            out_shape=out_shape,
            scratch_shapes=scratch,
            compiler_params=cparams,
        )(xp, w, b, rp)
    return out if Mp == M else out[:M]


def conv1x1_bn(x, p, *, stride=1, relu=False, residual=None, use_pallas=True):
    # x: (N, H, W, Kp) bf16 (channel-padded); p['w']: (Kp, Np) bf16 (BN folded), p['b']: (1, Np) f32.
    if stride > 1:
        # TODO(synk): fold the stride-2 subsampling into the producing kernel / an index_map
        # instead of an XLA strided slice.
        x = x[:, ::stride, ::stride, :]
    N, H, W, Kp = x.shape
    Np = p['w'].shape[1]
    r2 = None if residual is None else residual.reshape(N * H * W, Np)
    y = fused_matmul(x.reshape(N * H * W, Kp), p['w'], p['b'],
                     relu=relu, residual=r2, use_pallas=use_pallas)
    return y.reshape(N, H, W, Np)


def conv3x3_bn(x, p, *, stride=1, relu=True, use_pallas=True):
    # 3x3 conv, padding=0 (valid), BN folded into p['w'] (9, Kp, Np), + bias + [ReLU].
    N, H, W, Kp = x.shape
    s = stride
    Ho = (H - 3) // s + 1
    Wo = (W - 3) // s + 1
    Np = p['w'].shape[-1]

    if not use_pallas:  # reference: per-tap strided slices, same tap/accumulation order
        acc = jnp.zeros((N, Ho, Wo, Np), jnp.float32)
        t = 0
        for di in range(3):
            for dj in range(3):
                xs = x[:, di:di + (Ho - 1) * s + 1:s, dj:dj + (Wo - 1) * s + 1:s, :]
                acc = acc + jnp.dot(xs.reshape(-1, Kp), p['w'][t],
                                    preferred_element_type=jnp.float32).reshape(N, Ho, Wo, Np)
                t += 1
        acc = acc + p['b']
        if relu:
            acc = jnp.maximum(acc, 0.0)
        return acc.astype(jnp.bfloat16)

    # Phase-decomposed, full-geometry formulation: no 9x im2col tensor is written to HBM.
    # Tap (di,dj) of a stride-s conv reads phase (di%s, dj%s) at a constant flattened row
    # offset; rows outside the valid Ho x Wo window are garbage and cropped afterwards.
    Hp = -(-H // s)
    Wp = -(-W // s)
    if s == 1:
        phases = x[None]                                        # (1, N, H, W, Kp)
    else:
        ph = []
        for pi in range(s):
            for pj in range(s):
                q = x[:, pi::s, pj::s, :]
                q = jnp.pad(q, ((0, 0), (0, Hp - q.shape[1]), (0, Wp - q.shape[2]), (0, 0)))
                ph.append(q)
        phases = jnp.stack(ph, axis=0)                          # (s*s, N, Hp, Wp, Kp)
    m_rows = N * Hp * Wp
    max_off = (2 // s) * Wp + (2 // s)
    phases = phases.reshape(s * s, m_rows, Kp)
    phases = jnp.pad(phases, ((0, 0), (0, max_off), (0, 0)))    # keep tap reads in-bounds
    rows_pad = m_rows + max_off
    n_ph = s * s

    taps = tuple(((di % s) * s + (dj % s), (di // s) * Wp + (dj // s))
                 for di in range(3) for dj in range(3))

    out = pl.pallas_call(
        functools.partial(_conv3x3_kernel, taps=taps, m_rows=m_rows, relu=relu),
        grid=(1,),
        in_specs=[pl.BlockSpec((n_ph, rows_pad, Kp), lambda i: (0, 0, 0)),
                  pl.BlockSpec((9, Kp, Np), lambda i: (0, 0, 0)),
                  pl.BlockSpec((1, Np), lambda i: (0, 0))],
        out_specs=pl.BlockSpec((m_rows, Np), lambda i: (0, 0)),
        out_shape=jax.ShapeDtypeStruct((m_rows, Np), jnp.bfloat16),
        scratch_shapes=[pltpu.VMEM((m_rows, Np), jnp.float32)],
        compiler_params=pltpu.CompilerParams(
            dimension_semantics=("arbitrary",),
            vmem_limit_bytes=_vmem_limit()),
    )(phases, p['w'], p['b'])
    # TODO(synk): tile the 3x3 kernel over output rows for feature maps that exceed VMEM.
    return out.reshape(N, Hp, Wp, Np)[:, :Ho, :Wo, :]


def avgpool_fc(x, p, *, use_pallas=True):
    """x: (N, H, W, Cp) bf16 -> (N, num_classes) f32 via global average pool + fc."""
    N, H, W, Cp = x.shape
    HW = H * W
    w, b, ncls = p['w'], p['b'], p['n_out']
    if not use_pallas:
        pooled = jnp.sum(x.astype(jnp.float32), axis=(1, 2)) * (1.0 / HW)
        logits = jnp.dot(pooled.astype(jnp.bfloat16), w,
                         preferred_element_type=jnp.float32) + b
        return logits[:, :ncls]

    P = jnp.repeat(jnp.eye(N, dtype=jnp.bfloat16), HW, axis=1)   # (N, N*HW) pooling matrix
    x2 = x.reshape(N * HW, Cp)
    vmem = pl.BlockSpec(memory_space=pltpu.MemorySpace.VMEM)
    out = pl.pallas_call(
        functools.partial(_pool_fc_kernel, inv_hw=1.0 / HW),
        in_specs=[vmem, vmem, vmem, vmem],
        out_specs=vmem,
        out_shape=jax.ShapeDtypeStruct((N, w.shape[1]), jnp.float32),
        compiler_params=pltpu.CompilerParams(vmem_limit_bytes=_vmem_limit()),
    )(P, x2, w, b)
    return out[:, :ncls]


# ----------------------------- Model definition -----------------------------

def _conv_w(key, kh, kw, cin, cout):
    # PyTorch init: normal(0, sqrt(2 / (kh*kw*cout)))
    std = math.sqrt(2.0 / (kh * kw * cout))
    if kh == 1:
        return jax.random.normal(key, (cin, cout), jnp.float32) * std
    return jax.random.normal(key, (kh, kw, cin, cout), jnp.float32) * std


def _bn(c):
    # eval-mode BN with gamma=1, beta=0, running_mean=0, running_var=1
    scale = jnp.full((c,), 1.0 / math.sqrt(1.0 + BN_EPS), jnp.float32)
    bias = jnp.zeros((c,), jnp.float32)
    return scale, bias


def init_bagnet(key, layers, strides, kernel3, num_classes):
    keys = iter(jax.random.split(key, 128))
    params = {}
    params['conv1_w'] = _conv_w(next(keys), 1, 1, 3, 64)          # stem conv1 (no BN)
    params['conv2_w'] = _conv_w(next(keys), 3, 3, 64, 64)         # stem conv2
    params['bn1_s'], params['bn1_b'] = _bn(64)

    inplanes = 64
    stages = []
    for li, planes in enumerate((64, 128, 256, 512)):
        blocks = []
        for bi in range(layers[li]):
            if bi == 0:
                kernel = 1 if kernel3[li] == 0 else 3
                blk_stride = strides[li]
            else:
                kernel = 1 if kernel3[li] <= bi else 3
                blk_stride = 1
            downsample = None
            if bi == 0 and (blk_stride != 1 or inplanes != planes * EXPANSION):
                dw = _conv_w(next(keys), 1, 1, inplanes, planes * EXPANSION)
                ds_s, ds_b = _bn(planes * EXPANSION)
                downsample = (dw, ds_s, ds_b)
            bn1s, bn1b = _bn(planes)
            bn2s, bn2b = _bn(planes)
            bn3s, bn3b = _bn(planes * EXPANSION)
            blk = {
                'conv1_w': _conv_w(next(keys), 1, 1, inplanes, planes),
                'bn1_s': bn1s, 'bn1_b': bn1b,
                'conv2_w': _conv_w(next(keys), kernel, kernel, planes, planes),
                'bn2_s': bn2s, 'bn2_b': bn2b,
                'conv3_w': _conv_w(next(keys), 1, 1, planes, planes * EXPANSION),
                'bn3_s': bn3s, 'bn3_b': bn3b,
                'downsample': downsample,
                'stride': blk_stride,
                'kernel': kernel,
            }
            blocks.append(blk)
            inplanes = planes * EXPANSION
        stages.append(blocks)
    params['layers'] = stages

    params['fc_w'] = jax.random.normal(next(keys), (512 * EXPANSION, num_classes),
                                       jnp.float32) * 0.01
    params['fc_b'] = jax.random.normal(next(keys), (num_classes,), jnp.float32) * 0.01
    return params


# ---- one-time folding / padding / bf16 cast (outside the forward) ----

def _prep_1x1(w, scale, bias):
    cin, cout = w.shape
    kp, np_ = _round_up(cin, LANE), _round_up(cout, LANE)
    wf = (w * scale[None, :]).astype(jnp.bfloat16)
    wp = jnp.zeros((kp, np_), jnp.bfloat16).at[:cin, :cout].set(wf)
    bp = jnp.zeros((1, np_), jnp.float32).at[0, :cout].set(bias)
    return {'w': wp, 'b': bp}


def _prep_3x3(w, scale, bias):
    _, _, cin, cout = w.shape
    kp, np_ = _round_up(cin, LANE), _round_up(cout, LANE)
    wf = (w * scale[None, None, None, :]).reshape(9, cin, cout).astype(jnp.bfloat16)
    wp = jnp.zeros((9, kp, np_), jnp.bfloat16).at[:, :cin, :cout].set(wf)
    bp = jnp.zeros((1, np_), jnp.float32).at[0, :cout].set(bias)
    return {'w': wp, 'b': bp}


def _prep_fc(w, b):
    cin, cout = w.shape
    kp, np_ = _round_up(cin, LANE), _round_up(cout, LANE)
    wp = jnp.zeros((kp, np_), jnp.bfloat16).at[:cin, :cout].set(w.astype(jnp.bfloat16))
    bp = jnp.zeros((1, np_), jnp.float32).at[0, :cout].set(b)
    return {'w': wp, 'b': bp, 'n_out': cout}


def prepare_bagnet(params):
    prep = {}
    c1 = params['conv1_w']
    prep['conv1'] = _prep_1x1(c1, jnp.ones((c1.shape[1],), jnp.float32),
                              jnp.zeros((c1.shape[1],), jnp.float32))
    prep['conv2'] = _prep_3x3(params['conv2_w'], params['bn1_s'], params['bn1_b'])
    stages = []
    for stage in params['layers']:
        blocks = []
        for blk in stage:
            pb = {
                'conv1': _prep_1x1(blk['conv1_w'], blk['bn1_s'], blk['bn1_b']),
                'conv3': _prep_1x1(blk['conv3_w'], blk['bn3_s'], blk['bn3_b']),
                'stride': blk['stride'],
                'kernel': blk['kernel'],
            }
            if blk['kernel'] == 3:
                pb['conv2'] = _prep_3x3(blk['conv2_w'], blk['bn2_s'], blk['bn2_b'])
            else:
                pb['conv2'] = _prep_1x1(blk['conv2_w'], blk['bn2_s'], blk['bn2_b'])
            if blk['downsample'] is not None:
                dw, ds, db = blk['downsample']
                pb['downsample'] = _prep_1x1(dw, ds, db)
            else:
                pb['downsample'] = None
            blocks.append(pb)
        stages.append(blocks)
    prep['layers'] = stages
    prep['fc'] = _prep_fc(params['fc_w'], params['fc_b'])
    prep['in_cpad'] = _round_up(3, LANE)
    return prep


# ----------------------------- Forward -----------------------------

def bottleneck_forward(x, pb, *, use_pallas=True):
    out = conv1x1_bn(x, pb['conv1'], relu=True, use_pallas=use_pallas)
    if pb['kernel'] == 3:
        out = conv3x3_bn(out, pb['conv2'], stride=pb['stride'], relu=True,
                         use_pallas=use_pallas)
    else:
        out = conv1x1_bn(out, pb['conv2'], stride=pb['stride'], relu=True,
                         use_pallas=use_pallas)
    if pb['downsample'] is not None:
        residual = conv1x1_bn(x, pb['downsample'], stride=pb['stride'],
                              relu=False, use_pallas=use_pallas)
    else:
        residual = x
    Ho, Wo = out.shape[1], out.shape[2]
    residual = residual[:, :Ho, :Wo, :]          # BagNet residual crop
    # conv3 + bn3 + residual add + ReLU fused in one Pallas kernel
    out = conv1x1_bn(out, pb['conv3'], relu=True, residual=residual,
                     use_pallas=use_pallas)
    return out


def bagnet_forward(prep, x_nchw, *, use_pallas=True):
    x = jnp.transpose(x_nchw, (0, 2, 3, 1))                        # NCHW -> NHWC
    N, H, W, Cin = x.shape
    cp = prep['in_cpad']
    # one-time channel pad + bf16 cast of the input image; channels stay lane-padded all the
    # way through (padded weight rows/cols are zero, so padded channels stay exactly zero).
    xp = jnp.zeros((N, H, W, cp), jnp.bfloat16).at[..., :Cin].set(x.astype(jnp.bfloat16))
    x = conv1x1_bn(xp, prep['conv1'], relu=False, use_pallas=use_pallas)             # conv1
    x = conv3x3_bn(x, prep['conv2'], stride=1, relu=True, use_pallas=use_pallas)     # conv2+bn1+relu
    for stage in prep['layers']:
        for pb in stage:
            x = bottleneck_forward(x, pb, use_pallas=use_pallas)
    # avg_pool=True branch: global AvgPool2d(H) -> view -> fc
    return avgpool_fc(x, prep['fc'], use_pallas=use_pallas)
    # TODO(synk): avg_pool=False branch (per-patch logits via permute + fc) not exercised here.


# ----------------------------- Main -----------------------------

if __name__ == "__main__":
    key = jax.random.PRNGKey(0)
    k_params, k_x = jax.random.split(key)

    layers = (1, 1, 1, 1)
    strides = (1, 2, 2, 2)
    kernel3 = (1, 1, 0, 0)
    num_classes = 16

    raw_params = init_bagnet(k_params, layers, strides, kernel3, num_classes)
    prep = prepare_bagnet(raw_params)               # fold BN / pad / bf16 once, outside forward
    x = jax.random.normal(k_x, (2, 3, 16, 16), jnp.float32)   # NCHW like PyTorch

    out = jax.block_until_ready(bagnet_forward(prep, x, use_pallas=True))
    ref = jax.block_until_ready(bagnet_forward(prep, x, use_pallas=False))

    assert out.shape == (2, num_classes), out.shape
    np.testing.assert_allclose(np.asarray(out), np.asarray(ref), rtol=5e-2, atol=5e-2)
    print("KERNEL_OK")
</pallas_src>

<mosaic_0001>
module attributes {stable_mosaic.version = 11 : i64} {
  func.func @_mm_kernel(%arg0: i32, %arg1: i32, %arg2: memref<512x128xbf16, #tpu.memory_space<vmem>>, %arg3: memref<128x128xbf16, #tpu.memory_space<vmem>>, %arg4: memref<1x128xf32, #tpu.memory_space<vmem>>, %arg5: memref<512x128xbf16, #tpu.memory_space<vmem>>, %arg6: memref<512x128xf32, #tpu.memory_space<vmem>>) attributes {dimension_semantics = [#tpu.dimension_semantics<parallel>, #tpu.dimension_semantics<arbitrary>], iteration_bounds = array<i64: 1, 1>, scalar_prefetch = 0 : i64, scratch_operands = 1 : i64, tpu.core_type = #tpu.core_type<tc>, window_params = [{transform_indices = @transform_0, window_bounds = array<i64: 512, 128>}, {transform_indices = @transform_1, window_bounds = array<i64: 128, 128>}, {pipeline_mode = #tpu.pipeline_mode<synchronous>, transform_indices = @transform_2, window_bounds = array<i64: 1, 128>}, {transform_indices = @transform_3, window_bounds = array<i64: 512, 128>}]} {
    %c0_i32 = arith.constant 0 : i32
    %0 = arith.cmpi eq, %arg1, %c0_i32 : i32
    %1 = arith.extui %0 : i1 to i32
    %c0_i32_0 = arith.constant 0 : i32
    %2 = arith.cmpi ne, %1, %c0_i32_0 : i32
    scf.if %2 {
      %cst_10 = arith.constant 0.000000e+00 : f32
      %12 = vector.broadcast %cst_10 : f32 to vector<512x128xf32>
      %c0_11 = arith.constant 0 : index
      %c0_12 = arith.constant 0 : index
      %13 = vector.load %arg6[%c0_11, %c0_12] : memref<512x128xf32, #tpu.memory_space<vmem>>, vector<512x128xf32>
      tpu.vector_store %arg6[%c0_11, %c0_12], %12 {strides = array<i32>} : memref<512x128xf32, #tpu.memory_space<vmem>>, vector<512x128xf32>,
    } else {
    }
    %c0 = arith.constant 0 : index
    %c0_1 = arith.constant 0 : index
    %3 = vector.load %arg6[%c0, %c0_1] : memref<512x128xf32, #tpu.memory_space<vmem>>, vector<512x128xf32>
    %c0_2 = arith.constant 0 : index
    %c0_3 = arith.constant 0 : index
    %4 = vector.load %arg2[%c0_2, %c0_3] : memref<512x128xbf16, #tpu.memory_space<vmem>>, vector<512x128xbf16>
    %c0_4 = arith.constant 0 : index
    %c0_5 = arith.constant 0 : index
    %5 = vector.load %arg3[%c0_4, %c0_5] : memref<128x128xbf16, #tpu.memory_space<vmem>>, vector<128x128xbf16>
    %cst = arith.constant dense<0.000000e+00> : vector<512x128xf32>
    %6 = tpu.matmul %4, %5, %cst {dimension_numbers = #tpu.dot_dimension_numbers<[1], [0], [0], [1], [0, 0, 1, 1], [], []>} : vector<512x128xbf16>, vector<128x128xbf16>, vector<512x128xf32> -> vector<512x128xf32>
    %7 = arith.addf %3, %6 : vector<512x128xf32>
    %c0_6 = arith.constant 0 : index
    %c0_7 = arith.constant 0 : index
    %8 = vector.load %arg6[%c0_6, %c0_7] : memref<512x128xf32, #tpu.memory_space<vmem>>, vector<512x128xf32>
    tpu.vector_store %arg6[%c0_6, %c0_7], %7 {strides = array<i32>} : memref<512x128xf32, #tpu.memory_space<vmem>>, vector<512x128xf32>,
    %c0_i32_8 = arith.constant 0 : i32
    %9 = arith.cmpi eq, %arg1, %c0_i32_8 : i32
    %10 = arith.extui %9 : i1 to i32
    %c0_i32_9 = arith.constant 0 : i32
    %11 = arith.cmpi ne, %10, %c0_i32_9 : i32
    scf.if %11 {
      %c0_10 = arith.constant 0 : index
      %c0_11 = arith.constant 0 : index
      %12 = vector.load %arg6[%c0_10, %c0_11] : memref<512x128xf32, #tpu.memory_space<vmem>>, vector<512x128xf32>
      %c0_12 = arith.constant 0 : index
      %c0_13 = arith.constant 0 : index
      %13 = vector.load %arg4[%c0_12, %c0_13] : memref<1x128xf32, #tpu.memory_space<vmem>>, vector<1x128xf32>
      %14 = vector.broadcast %13 : vector<1x128xf32> to vector<512x128xf32>
      %15 = arith.addf %12, %14 : vector<512x128xf32>
      %16 = arith.truncf %15 : vector<512x128xf32> to vector<512x128xbf16>
      %c0_14 = arith.constant 0 : index
      %c0_15 = arith.constant 0 : index
      %17 = vector.load %arg5[%c0_14, %c0_15] : memref<512x128xbf16, #tpu.memory_space<vmem>>, vector<512x128xbf16>
      tpu.vector_store %arg5[%c0_14, %c0_15], %16 {strides = array<i32>} : memref<512x128xbf16, #tpu.memory_space<vmem>>, vector<512x128xbf16>,
    } else {
    }
    return
  }
  func.func @transform_0(%arg0: i32, %arg1: i32) -> (i32, i32) {
    %c0_i32 = arith.constant 0 : i32
    return %arg0, %arg1 : i32, i32
  }
  func.func @transform_1(%arg0: i32, %arg1: i32) -> (i32, i32) {
    %c0_i32 = arith.constant 0 : i32
    %c0_i32_0 = arith.constant 0 : i32
    return %arg1, %c0_i32 : i32, i32
  }
  func.func @transform_2(%arg0: i32, %arg1: i32) -> (i32, i32) {
    %c0_i32 = arith.constant 0 : i32
    %c0_i32_0 = arith.constant 0 : i32
    %c0_i32_1 = arith.constant 0 : i32
    return %c0_i32, %c0_i32_0 : i32, i32
  }
  func.func @transform_3(%arg0: i32, %arg1: i32) -> (i32, i32) {
    %c0_i32 = arith.constant 0 : i32
    %c0_i32_0 = arith.constant 0 : i32
    return %arg0, %c0_i32 : i32, i32
  }
}

</mosaic_0001>

<bundles_post_ra>
// kernel: tpu_custom_call.1
= control target key start
LH: loop header
LB: loop body
LE: loop exit
PB: predicated region body
PF: predicated region fallthrough
CT: control target
= control target key end

     0   :  { %8 = vsyncpa [#allocation4], 0  ;;  %s2108_s0 = inlined_call_operand.hbm [shape: bf16[512,128], index: 0, kind: input, shape index: {}]   ;;  %s2109_s1 = inlined_call_operand.hbm [shape: bf16[128,128], index: 1, kind: input, shape index: {}]   ;;  %s2110_s2 = inlined_call_operand.vmem [shape: f32[1,128], index: 2, kind: input, shape index: {}]   ;;  %s2111_s3 = inlined_call_operand.hbm [shape: bf16[512,128], index: 3, kind: output, shape index: {}]  }
   0x1   :  { %9 = vsyncpa [#allocation7], 0 }
   0x2   :  { %10 = vsyncpa [#allocation5], 0  ;;  %s1996_s12 = smov [#allocation3]  }
   0x3   :  { %s16_s13 = sshll.u32 %s1996_s12, 4  ;;  %s17_s13 = int_to_ptr.vmem [resolvable:$true] %s16_s13 }
   0x4   :  { %s1938_s14 = scalar_lea.vmem %s17_s13, 4096  ;;  %p1943_p1 = scmp.lt.s32.totalorder %s17_s13, %s17_s13 }
   0x5   :  { %p1939_p0 = scmp.ne.s32.totalorder %s17_s13, %s1938_s14  ;;  %p1944_p2 = scmp.lt.s32.totalorder %s1938_s14, %s1938_s14 }
   0x7   :  { %p1945_p3 = por %p1944_p2, %p1943_p1 }
   0x9   :  { %p1946_p4 = pnand %p1945_p3, %p1939_p0 }
   0xb   :  { %1949 = shalt.err (!%p1946_p4)
}
   0xc   :  { %s1997_s15 = smov 64   ;;  %s1998_s16 = smov 4  }
   0xd   :  { %22 = dma.hbm_to_vmem [thread:$0]  %s2108_s0, 4096, %s17_s13, [#allocation4], %s1997_s15, %s1997_s15, %s1998_s16  }
   0xe   :  { %s1999_s19 = smov [#allocation6]  }
   0xf   :  { %s28_s20 = sshll.u32 %s1999_s19, 4  ;;  %s29_s20 = int_to_ptr.vmem [resolvable:$true] %s28_s20 }
  0x10   :  { %s1958_s21 = scalar_lea.vmem %s29_s20, 1024  ;;  %p1963_p6 = scmp.lt.s32.totalorder %s29_s20, %s29_s20 }
  0x11   :  { %p1959_p5 = scmp.ne.s32.totalorder %s29_s20, %s1958_s21  ;;  %p1964_p7 = scmp.lt.s32.totalorder %s1958_s21, %s1958_s21 }
  0x13   :  { %p1965_p8 = por %p1964_p7, %p1963_p6 }
  0x15   :  { %p1966_p9 = pnand %p1965_p8, %p1959_p5 }
  0x17   :  { %1969 = shalt.err (!%p1966_p9)
}
  0x18   :  { %34 = dma.hbm_to_vmem [thread:$0]  %s2109_s1, 1024, %s29_s20, [#allocation7], %s1997_s15, %s1997_s15, %s1998_s16  }
  0x19   :  { %1990 = dma.done.wait [#allocation4], 4096  }
  0x1a   :  { %1991 = vsyncadd [#allocation4], 4294963200 }
  0x1b   :  { %1992 = dma.done.wait [#allocation7], 1024  }
  0x1c   :  { %1993 = vsyncadd [#allocation7], 4294966272  ;;  %v1890_v0 = vld [vmem:[#allocation6 + $0x38] sm:$0xff]   ;;  %v1891_v1 = vld [vmem:[#allocation6 + $0x30] sm:$0xff]  }
  0x1d   :  { %1789 = vmatprep.subr.bf16.mxu0 %v1890_v0  ;;  %1869 = vmatprep.subr.bf16.mxu1 %v1890_v0  ;;  %v1892_v2 = vld [vmem:[#allocation6 + $0x28] sm:$0xff]   ;;  %v1893_v3 = vld [vmem:[#allocation6 + $0x20] sm:$0xff]   ;;  %v1894_v6 = vld [vmem:[#allocation6 + $0x18] sm:$0xff]  }
  0x1e   :  { %1790 = vmatpush3.bf16.msra.mxu0 %v1890_v0  ;;  %1877 = vmatpush3.bf16.msra.mxu1 %v1890_v0  ;;  %v1898_v4 = vld [vmem:[#allocation3] sm:$0xff]   ;;  %v1895_v7 = vld [vmem:[#allocation6 + $0x10] sm:$0xff]   ;;  %v1896_v8 = vld [vmem:[#allocation6 + $0x8] sm:$0xff]  }
  0x1f   :  { %1791 = vmatprep.subr.bf16.mxu0 %v1891_v1  ;;  %1870 = vmatprep.subr.bf16.mxu1 %v1891_v1  ;;  %v1899_v5 = vld [vmem:[#allocation3 + $0x80] sm:$0xff]   ;;  %v1900_v10 = vld [vmem:[#allocation3 + $0x8] sm:$0xff]   ;;  %v1902_v12 = vld [vmem:[#allocation3 + $0x10] sm:$0xff]  }
  0x20   :  { %1805 = vmatprep.mubr.bf16.mxu0 %v1898_v4  ;;  %1837 = vmatprep.mubr.bf16.mxu1 %v1899_v5  ;;  %v1897_v9 = vld [vmem:[#allocation6] sm:$0xff]   ;;  %v1901_v11 = vld [vmem:[#allocation3 + $0x88] sm:$0xff]   ;;  %v1903_v13 = vld [vmem:[#allocation3 + $0x90] sm:$0xff]  }
  0x21   :  { %v1904_v14 = vld [vmem:[#allocation3 + $0x18] sm:$0xff]   ;;  %v1906_v16 = vld [vmem:[#allocation3 + $0x20] sm:$0xff]   ;;  %v1908_v18 = vld [vmem:[#allocation3 + $0x28] sm:$0xff]  }
  0x22   :  { %1792 = vmatpush3.bf16.msra.mxu0 %v1891_v1  ;;  %1878 = vmatpush3.bf16.msra.mxu1 %v1891_v1  ;;  %v1905_v15 = vld [vmem:[#allocation3 + $0x98] sm:$0xff]   ;;  %v1907_v17 = vld [vmem:[#allocation3 + $0xa0] sm:$0xff]   ;;  %v1909_v19 = vld [vmem:[#allocation3 + $0xa8] sm:$0xff]  }
  0x23   :  { %1793 = vmatprep.subr.bf16.mxu0 %v1892_v2  ;;  %1871 = vmatprep.subr.bf16.mxu1 %v1892_v2  ;;  %v1910_v20 = vld [vmem:[#allocation3 + $0x30] sm:$0xff]   ;;  %v1912_v22 = vld [vmem:[#allocation3 + $0x38] sm:$0xff]   ;;  %v1914_v24 = vld [vmem:[#allocation3 + $0x40] sm:$0xff]  }
  0x24   :  { %v1911_v21 = vld [vmem:[#allocation3 + $0xb0] sm:$0xff]   ;;  %v1913_v23 = vld [vmem:[#allocation3 + $0xb8] sm:$0xff]   ;;  %v1915_v25 = vld [vmem:[#allocation3 + $0xc0] sm:$0xff]  }
  0x25   :  { %v1916_v26 = vld [vmem:[#allocation3 + $0x48] sm:$0xff]   ;;  %v1918_v28 = vld [vmem:[#allocation3 + $0x50] sm:$0xff]   ;;  %v1920_v30 = vld [vmem:[#allocation3 + $0x58] sm:$0xff]  }
  0x26   :  { %1794 = vmatpush3.bf16.msra.mxu0 %v1892_v2  ;;  %1879 = vmatpush3.bf16.msra.mxu1 %v1892_v2  ;;  %v1917_v27 = vld [vmem:[#allocation3 + $0xc8] sm:$0xff]   ;;  %v1919_v29 = vld [vmem:[#allocation3 + $0xd0] sm:$0xff]   ;;  %v1921_v31 = vld [vmem:[#allocation3 + $0xd8] sm:$0xff]  }
  0x27   :  { %1795 = vmatprep.subr.bf16.mxu0 %v1893_v3  ;;  %1872 = vmatprep.subr.bf16.mxu1 %v1893_v3  ;;  %v1922_v32 = vld [vmem:[#allocation3 + $0x60] sm:$0xff]   ;;  %v1924_v34 = vld [vmem:[#allocation3 + $0x68] sm:$0xff]   ;;  %v1926_v36 = vld [vmem:[#allocation3 + $0x70] sm:$0xff]  }
  0x28   :  { %v1923_v33 = vld [vmem:[#allocation3 + $0xe0] sm:$0xff]   ;;  %v1925_v35 = vld [vmem:[#allocation3 + $0xe8] sm:$0xff]   ;;  %v1927_v37 = vld [vmem:[#allocation3 + $0xf0] sm:$0xff]  }
  0x29   :  { %v1928_v38 = vld [vmem:[#allocation3 + $0x78] sm:$0xff]   ;;  %v2036_v42 = vld [vmem:[%s2110_s2] ss:$0 sm:$0xff]  ;;  %s2000_s2 = smov [#allocation8]  }
  0x2a   :  { %1796 = vmatpush3.bf16.msra.mxu0 %v1893_v3  ;;  %1880 = vmatpush3.bf16.msra.mxu1 %v1893_v3  ;;  %v1929_v39 = vld [vmem:[#allocation3 + $0xf8] sm:$0xff]   ;;  %s1376_s24 = sshll.u32 %s2000_s2, 4  ;;  %s1377_s24 = int_to_ptr.vmem [resolvable:$true] %s1376_s24 }
  0x2b   :  { %1797 = vmatprep.subr.bf16.mxu0 %v1894_v6  ;;  %1873 = vmatprep.subr.bf16.mxu1 %v1894_v6  ;;  %s1970_s25 = scalar_lea.vmem %s1377_s24, 4096  ;;  %p1975_p11 = scmp.lt.s32.totalorder %s1377_s24, %s1377_s24 }
  0x2c   :  { %p1971_p10 = scmp.ne.s32.totalorder %s1377_s24, %s1970_s25  ;;  %p1976_p12 = scmp.lt.s32.totalorder %s1970_s25, %s1970_s25 }
  0x2e   :  { %1798 = vmatpush3.bf16.msra.mxu0 %v1894_v6  ;;  %1881 = vmatpush3.bf16.msra.mxu1 %v1894_v6  ;;  %p1977_p13 = por %p1976_p12, %p1975_p11 }
  0x2f   :  { %1799 = vmatprep.subr.bf16.mxu0 %v1895_v7  ;;  %1874 = vmatprep.subr.bf16.mxu1 %v1895_v7 }
  0x30   :  { %p1978_p0 = pnand %p1977_p13, %p1971_p10 }
  0x32   :  { %1800 = vmatpush3.bf16.msra.mxu0 %v1895_v7  ;;  %1882 = vmatpush3.bf16.msra.mxu1 %v1895_v7 }
  0x33   :  { %1801 = vmatprep.subr.bf16.mxu0 %v1896_v8  ;;  %1875 = vmatprep.subr.bf16.mxu1 %v1896_v8 }
  0x36   :  { %1802 = vmatpush3.bf16.msra.mxu0 %v1896_v8  ;;  %1883 = vmatpush3.bf16.msra.mxu1 %v1896_v8 }
  0x37   :  { %1803 = vmatprep.subr.bf16.mxu0 %v1897_v9  ;;  %1876 = vmatprep.subr.bf16.mxu1 %v1897_v9 }
  0x3a   :  { %1804 = vmatpush3.bf16.msra.mxu0 %v1897_v9  ;;  %1884 = vmatpush3.bf16.msra.mxu1 %v1897_v9 }
  0x3d   :  { %1806 = vmatmul.mubr.bf16.vlgmr.msra.gmra.mxu0 %v1900_v10  ;;  %1838 = vmatmul.mubr.bf16.vlgmr.msra.gmra.mxu1 %v1901_v11 }
  0x3e   :  { %1809 = vmatprep.mubr.bf16.mxu0 %v1902_v12  ;;  %1841 = vmatprep.mubr.bf16.mxu1 %v1903_v13 }
  0x45   :  { %1810 = vmatmul.mubr.bf16.gmra.mxu0 %v1904_v14  ;;  %1842 = vmatmul.mubr.bf16.gmra.mxu1 %v1905_v15 }
  0x46   :  { %1813 = vmatprep.mubr.bf16.mxu0 %v1906_v16  ;;  %1845 = vmatprep.mubr.bf16.mxu1 %v1907_v17 }
  0x4d   :  { %1814 = vmatmul.mubr.bf16.gmra.mxu0 %v1908_v18  ;;  %1846 = vmatmul.mubr.bf16.gmra.mxu1 %v1909_v19 }
  0x4e   :  { %1817 = vmatprep.mubr.bf16.mxu0 %v1910_v20  ;;  %1849 = vmatprep.mubr.bf16.mxu1 %v1911_v21 }
  0x55   :  { %1818 = vmatmul.mubr.bf16.gmra.mxu0 %v1912_v22  ;;  %1850 = vmatmul.mubr.bf16.gmra.mxu1 %v1913_v23 }
  0x56   :  { %1821 = vmatprep.mubr.bf16.mxu0 %v1914_v24  ;;  %1853 = vmatprep.mubr.bf16.mxu1 %v1915_v25 }
  0x5d   :  { %1822 = vmatmul.mubr.bf16.gmra.mxu0 %v1916_v26  ;;  %1854 = vmatmul.mubr.bf16.gmra.mxu1 %v1917_v27 }
  0x5e   :  { %1825 = vmatprep.mubr.bf16.mxu0 %v1918_v28  ;;  %1857 = vmatprep.mubr.bf16.mxu1 %v1919_v29 }
  0x65   :  { %1826 = vmatmul.mubr.bf16.gmra.mxu0 %v1920_v30  ;;  %1858 = vmatmul.mubr.bf16.gmra.mxu1 %v1921_v31 }
  0x66   :  { %1829 = vmatprep.mubr.bf16.mxu0 %v1922_v32  ;;  %1861 = vmatprep.mubr.bf16.mxu1 %v1923_v33 }
  0x6d   :  { %1830 = vmatmul.mubr.bf16.gmra.mxu0 %v1924_v34  ;;  %1862 = vmatmul.mubr.bf16.gmra.mxu1 %v1925_v35 }
  0x6e   :  { %1833 = vmatprep.mubr.bf16.mxu0 %v1926_v36  ;;  %1865 = vmatprep.mubr.bf16.mxu1 %v1927_v37 }
  0x75   :  { %1834 = vmatmul.mubr.bf16.gmra.mxu0 %v1928_v38  ;;  %1866 = vmatmul.mubr.bf16.gmra.mxu1 %v1929_v39 }
  0xfd   :  { %v1807_v40 = vpop.f32.mrf.mxu0  ;;  %v1839_v41 = vpop.f32.mrf.mxu1 }
  0xfe   :  { %v989_v47 = vadd.f32 %v1807_v40, %v2036_v42  ;;  %v1021_v48 = vadd.f32 %v1839_v41, %v2036_v42 }
  0xff   :  { %v530_v43 = vpop.f32.mrf.mxu0  ;;  %v658_v44 = vpop.f32.mrf.mxu1 }
 0x100   :  { %v987_v51 = vadd.f32 %v2036_v42, %v530_v43  ;;  %v1019_v52 = vadd.f32 %v2036_v42, %v658_v44 }
 0x101   :  { %v1808_v45 = vpop.f32.mrf.mxu0  ;;  %v1840_v46 = vpop.f32.mrf.mxu1 }
 0x102   :  { %v990_v49 = vadd.f32 %v1808_v45, %v2036_v42  ;;  %v1022_v50 = vadd.f32 %v1840_v46, %v2036_v42 }
 0x103   :  { %v533_v53 = vpop.f32.mrf.mxu0  ;;  %v661_v54 = vpop.f32.mrf.mxu1 }
 0x104   :  { %v1566_v55 = vpack.c.bf16 %v990_v49, %v989_v47  ;;  %v1646_v56 = vpack.c.bf16 %v1022_v50, %v1021_v48  ;;  %v988_v57 = vadd.f32 %v2036_v42, %v533_v53  ;;  %v1020_v58 = vadd.f32 %v2036_v42, %v661_v54 }
 0x105   :  { %v1811_v59 = vpop.f32.mrf.mxu0  ;;  %v1843_v60 = vpop.f32.mrf.mxu1 }
 0x106   :  { %1718 = vst [vmem:[#allocation8 + $0x8] sm:$0xff] %v1566_v55   ;;  %1734 = vst [vmem:[#allocation8 + $0x88] sm:$0xff] %v1646_v56   ;;  %v1561_v61 = vpack.c.bf16 %v988_v57, %v987_v51  ;;  %v1641_v62 = vpack.c.bf16 %v1020_v58, %v1019_v52  ;;  %v993_v3 = vadd.f32 %v1811_v59, %v2036_v42 }
 0x107   :  { %v546_v63 = vpop.f32.mrf.mxu0  ;;  %v674_v0 = vpop.f32.mrf.mxu1  ;;  %v1025_v4 = vadd.f32 %v1843_v60, %v2036_v42 }
 0x108   :  { %1562 = vst [vmem:[#allocation8] sm:$0xff] %v1561_v61   ;;  %1733 = vst [vmem:[#allocation8 + $0x80] sm:$0xff] %v1641_v62   ;;  %v991_v7 = vadd.f32 %v2036_v42, %v546_v63  ;;  %v1023_v8 = vadd.f32 %v2036_v42, %v674_v0 }
 0x109   :  { %v1812_v1 = vpop.f32.mrf.mxu0  ;;  %v1844_v2 = vpop.f32.mrf.mxu1 }
 0x10a   :  { %v994_v5 = vadd.f32 %v1812_v1, %v2036_v42  ;;  %v1026_v6 = vadd.f32 %v1844_v2, %v2036_v42 }
 0x10b   :  { %v549_v9 = vpop.f32.mrf.mxu0  ;;  %v677_v10 = vpop.f32.mrf.mxu1 }
 0x10c   :  { %v1576_v11 = vpack.c.bf16 %v994_v5, %v993_v3  ;;  %v1656_v12 = vpack.c.bf16 %v1026_v6, %v1025_v4  ;;  %v992_v13 = vadd.f32 %v2036_v42, %v549_v9  ;;  %v1024_v14 = vadd.f32 %v2036_v42, %v677_v10 }
 0x10d   :  { %v1815_v15 = vpop.f32.mrf.mxu0  ;;  %v1847_v16 = vpop.f32.mrf.mxu1 }
 0x10e   :  { %1720 = vst [vmem:[#allocation8 + $0x18] sm:$0xff] %v1576_v11   ;;  %1736 = vst [vmem:[#allocation8 + $0x98] sm:$0xff] %v1656_v12   ;;  %v1571_v17 = vpack.c.bf16 %v992_v13, %v991_v7  ;;  %v1651_v18 = vpack.c.bf16 %v1024_v14, %v1023_v8  ;;  %v997_v23 = vadd.f32 %v1815_v15, %v2036_v42 }
 0x10f   :  { %v562_v19 = vpop.f32.mrf.mxu0  ;;  %v690_v20 = vpop.f32.mrf.mxu1  ;;  %v1029_v24 = vadd.f32 %v1847_v16, %v2036_v42 }
 0x110   :  { %1719 = vst [vmem:[#allocation8 + $0x10] sm:$0xff] %v1571_v17   ;;  %1735 = vst [vmem:[#allocation8 + $0x90] sm:$0xff] %v1651_v18   ;;  %v995_v27 = vadd.f32 %v2036_v42, %v562_v19  ;;  %v1027_v28 = vadd.f32 %v2036_v42, %v690_v20 }
 0x111   :  { %v1816_v21 = vpop.f32.mrf.mxu0  ;;  %v1848_v22 = vpop.f32.mrf.mxu1 }
 0x112   :  { %v998_v25 = vadd.f32 %v1816_v21, %v2036_v42  ;;  %v1030_v26 = vadd.f32 %v1848_v22, %v2036_v42 }
 0x113   :  { %v565_v29 = vpop.f32.mrf.mxu0  ;;  %v693_v30 = vpop.f32.mrf.mxu1 }
 0x114   :  { %v1586_v31 = vpack.c.bf16 %v998_v25, %v997_v23  ;;  %v1666_v32 = vpack.c.bf16 %v1030_v26, %v1029_v24  ;;  %v996_v33 = vadd.f32 %v2036_v42, %v565_v29  ;;  %v1028_v34 = vadd.f32 %v2036_v42, %v693_v30 }
 0x115   :  { %v1819_v35 = vpop.f32.mrf.mxu0  ;;  %v1851_v36 = vpop.f32.mrf.mxu1 }
 0x116   :  { %1722 = vst [vmem:[#allocation8 + $0x28] sm:$0xff] %v1586_v31   ;;  %1738 = vst [vmem:[#allocation8 + $0xa8] sm:$0xff] %v1666_v32   ;;  %v1581_v37 = vpack.c.bf16 %v996_v33, %v995_v27  ;;  %v1661_v38 = vpack.c.bf16 %v1028_v34, %v1027_v28  ;;  %v1001_v44 = vadd.f32 %v1819_v35, %v2036_v42 }
 0x117   :  { %v578_v39 = vpop.f32.mrf.mxu0  ;;  %v706_v40 = vpop.f32.mrf.mxu1  ;;  %v1033_v45 = vadd.f32 %v1851_v36, %v2036_v42 }
 0x118   :  { %1721 = vst [vmem:[#allocation8 + $0x20] sm:$0xff] %v1581_v37   ;;  %1737 = vst [vmem:[#allocation8 + $0xa0] sm:$0xff] %v1661_v38   ;;  %v999_v48 = vadd.f32 %v2036_v42, %v578_v39  ;;  %v1031_v49 = vadd.f32 %v2036_v42, %v706_v40 }
 0x119   :  { %v1820_v41 = vpop.f32.mrf.mxu0  ;;  %v1852_v43 = vpop.f32.mrf.mxu1 }
 0x11a   :  { %v1002_v46 = vadd.f32 %v1820_v41, %v2036_v42  ;;  %v1034_v47 = vadd.f32 %v1852_v43, %v2036_v42 }
 0x11b   :  { %v581_v50 = vpop.f32.mrf.mxu0  ;;  %v709_v51 = vpop.f32.mrf.mxu1 }
 0x11c   :  { %v1596_v52 = vpack.c.bf16 %v1002_v46, %v1001_v44  ;;  %v1676_v53 = vpack.c.bf16 %v1034_v47, %v1033_v45  ;;  %v1000_v54 = vadd.f32 %v2036_v42, %v581_v50  ;;  %v1032_v55 = vadd.f32 %v2036_v42, %v709_v51 }
 0x11d   :  { %v1823_v56 = vpop.f32.mrf.mxu0  ;;  %v1855_v57 = vpop.f32.mrf.mxu1 }
 0x11e   :  { %1724 = vst [vmem:[#allocation8 + $0x38] sm:$0xff] %v1596_v52   ;;  %1740 = vst [vmem:[#allocation8 + $0xb8] sm:$0xff] %v1676_v53   ;;  %v1591_v58 = vpack.c.bf16 %v1000_v54, %v999_v48  ;;  %v1671_v59 = vpack.c.bf16 %v1032_v55, %v1031_v49  ;;  %v1005_v0 = vadd.f32 %v1823_v56, %v2036_v42 }
 0x11f   :  { %v594_v60 = vpop.f32.mrf.mxu0  ;;  %v722_v61 = vpop.f32.mrf.mxu1  ;;  %v1037_v1 = vadd.f32 %v1855_v57, %v2036_v42 }
 0x120   :  { %1723 = vst [vmem:[#allocation8 + $0x30] sm:$0xff] %v1591_v58   ;;  %1739 = vst [vmem:[#allocation8 + $0xb0] sm:$0xff] %v1671_v59   ;;  %v1003_v4 = vadd.f32 %v2036_v42, %v594_v60  ;;  %v1035_v5 = vadd.f32 %v2036_v42, %v722_v61 }
 0x121   :  { %v1824_v62 = vpop.f32.mrf.mxu0  ;;  %v1856_v63 = vpop.f32.mrf.mxu1 }
 0x122   :  { %v1006_v2 = vadd.f32 %v1824_v62, %v2036_v42  ;;  %v1038_v3 = vadd.f32 %v1856_v63, %v2036_v42 }
 0x123   :  { %v597_v6 = vpop.f32.mrf.mxu0  ;;  %v725_v7 = vpop.f32.mrf.mxu1 }
 0x124   :  { %v1606_v8 = vpack.c.bf16 %v1006_v2, %v1005_v0  ;;  %v1686_v9 = vpack.c.bf16 %v1038_v3, %v1037_v1  ;;  %v1004_v10 = vadd.f32 %v2036_v42, %v597_v6  ;;  %v1036_v11 = vadd.f32 %v2036_v42, %v725_v7 }
 0x125   :  { %v1827_v12 = vpop.f32.mrf.mxu0  ;;  %v1859_v13 = vpop.f32.mrf.mxu1 }
 0x126   :  { %1726 = vst [vmem:[#allocation8 + $0x48] sm:$0xff] %v1606_v8   ;;  %1742 = vst [vmem:[#allocation8 + $0xc8] sm:$0xff] %v1686_v9   ;;  %v1601_v14 = vpack.c.bf16 %v1004_v10, %v1003_v4  ;;  %v1681_v15 = vpack.c.bf16 %v1036_v11, %v1035_v5  ;;  %v1009_v20 = vadd.f32 %v1827_v12, %v2036_v42 }
 0x127   :  { %v610_v16 = vpop.f32.mrf.mxu0  ;;  %v738_v17 = vpop.f32.mrf.mxu1  ;;  %v1041_v21 = vadd.f32 %v1859_v13, %v2036_v42 }
 0x128   :  { %1725 = vst [vmem:[#allocation8 + $0x40] sm:$0xff] %v1601_v14   ;;  %1741 = vst [vmem:[#allocation8 + $0xc0] sm:$0xff] %v1681_v15   ;;  %v1007_v24 = vadd.f32 %v2036_v42, %v610_v16  ;;  %v1039_v25 = vadd.f32 %v2036_v42, %v738_v17 }
 0x129   :  { %v1828_v18 = vpop.f32.mrf.mxu0  ;;  %v1860_v19 = vpop.f32.mrf.mxu1 }
 0x12a   :  { %v1010_v22 = vadd.f32 %v1828_v18, %v2036_v42  ;;  %v1042_v23 = vadd.f32 %v1860_v19, %v2036_v42 }
 0x12b   :  { %v613_v26 = vpop.f32.mrf.mxu0  ;;  %v741_v27 = vpop.f32.mrf.mxu1 }
 0x12c   :  { %v1616_v28 = vpack.c.bf16 %v1010_v22, %v1009_v20  ;;  %v1696_v29 = vpack.c.bf16 %v1042_v23, %v1041_v21  ;;  %v1008_v30 = vadd.f32 %v2036_v42, %v613_v26  ;;  %v1040_v31 = vadd.f32 %v2036_v42, %v741_v27 }
 0x12d   :  { %v1831_v32 = vpop.f32.mrf.mxu0  ;;  %v1863_v33 = vpop.f32.mrf.mxu1 }
 0x12e   :  { %1728 = vst [vmem:[#allocation8 + $0x58] sm:$0xff] %v1616_v28   ;;  %1744 = vst [vmem:[#allocation8 + $0xd8] sm:$0xff] %v1696_v29   ;;  %v1611_v34 = vpack.c.bf16 %v1008_v30, %v1007_v24  ;;  %v1691_v35 = vpack.c.bf16 %v1040_v31, %v1039_v25  ;;  %v1013_v40 = vadd.f32 %v1831_v32, %v2036_v42 }
 0x12f   :  { %v626_v36 = vpop.f32.mrf.mxu0  ;;  %v754_v37 = vpop.f32.mrf.mxu1  ;;  %v1045_v41 = vadd.f32 %v1863_v33, %v2036_v42 }
 0x130   :  { %1727 = vst [vmem:[#allocation8 + $0x50] sm:$0xff] %v1611_v34   ;;  %1743 = vst [vmem:[#allocation8 + $0xd0] sm:$0xff] %v1691_v35   ;;  %v1011_v45 = vadd.f32 %v2036_v42, %v626_v36  ;;  %v1043_v46 = vadd.f32 %v2036_v42, %v754_v37 }
 0x131   :  { %v1832_v38 = vpop.f32.mrf.mxu0  ;;  %v1864_v39 = vpop.f32.mrf.mxu1 }
 0x132   :  { %v1014_v43 = vadd.f32 %v1832_v38, %v2036_v42  ;;  %v1046_v44 = vadd.f32 %v1864_v39, %v2036_v42 }
 0x133   :  { %v629_v47 = vpop.f32.mrf.mxu0  ;;  %v757_v48 = vpop.f32.mrf.mxu1 }
 0x134   :  { %v1626_v49 = vpack.c.bf16 %v1014_v43, %v1013_v40  ;;  %v1706_v50 = vpack.c.bf16 %v1046_v44, %v1045_v41  ;;  %v1012_v51 = vadd.f32 %v2036_v42, %v629_v47  ;;  %v1044_v52 = vadd.f32 %v2036_v42, %v757_v48 }
 0x135   :  { %v1835_v53 = vpop.f32.mrf.mxu0  ;;  %v1867_v54 = vpop.f32.mrf.mxu1 }
 0x136   :  { %1730 = vst [vmem:[#allocation8 + $0x68] sm:$0xff] %v1626_v49   ;;  %1746 = vst [vmem:[#allocation8 + $0xe8] sm:$0xff] %v1706_v50   ;;  %v1621_v55 = vpack.c.bf16 %v1012_v51, %v1011_v45  ;;  %v1701_v56 = vpack.c.bf16 %v1044_v52, %v1043_v46  ;;  %v1017_v61 = vadd.f32 %v1835_v53, %v2036_v42 }
 0x137   :  { %v642_v57 = vpop.f32.mrf.mxu0  ;;  %v770_v58 = vpop.f32.mrf.mxu1  ;;  %v1049_v62 = vadd.f32 %v1867_v54, %v2036_v42 }
 0x138   :  { %1729 = vst [vmem:[#allocation8 + $0x60] sm:$0xff] %v1621_v55   ;;  %1745 = vst [vmem:[#allocation8 + $0xe0] sm:$0xff] %v1701_v56   ;;  %v1015_v1 = vadd.f32 %v2036_v42, %v642_v57  ;;  %v1047_v2 = vadd.f32 %v2036_v42, %v770_v58 }
 0x139   :  { %v1836_v59 = vpop.f32.mrf.mxu0  ;;  %v1868_v60 = vpop.f32.mrf.mxu1 }
 0x13a   :  { %v1018_v63 = vadd.f32 %v1836_v59, %v2036_v42  ;;  %v1050_v0 = vadd.f32 %v1868_v60, %v2036_v42 }
 0x13b   :  { %v645_v3 = vpop.f32.mrf.mxu0  ;;  %v773_v4 = vpop.f32.mrf.mxu1 }
 0x13c   :  { %v1636_v5 = vpack.c.bf16 %v1018_v63, %v1017_v61  ;;  %v1716_v6 = vpack.c.bf16 %v1050_v0, %v1049_v62  ;;  %v1016_v7 = vadd.f32 %v2036_v42, %v645_v3  ;;  %v1048_v8 = vadd.f32 %v2036_v42, %v773_v4 }
 0x13e   :  { %1732 = vst [vmem:[#allocation8 + $0x78] sm:$0xff] %v1636_v5   ;;  %1748 = vst [vmem:[#allocation8 + $0xf8] sm:$0xff] %v1716_v6   ;;  %v1631_v9 = vpack.c.bf16 %v1016_v7, %v1015_v1  ;;  %v1711_v10 = vpack.c.bf16 %v1048_v8, %v1047_v2 }
 0x140   :  { %1731 = vst [vmem:[#allocation8 + $0x70] sm:$0xff] %v1631_v9   ;;  %1747 = vst [vmem:[#allocation8 + $0xf0] sm:$0xff] %v1711_v10  }
 0x141   :  { %1981 = shalt.err (!%p1978_p0)
}
 0x142   :  { %1382 = dma.vmem_to_hbm [thread:$0]  %s1377_s24, 4096, %s2111_s3, [#allocation5], %s1997_s15, %s1997_s15, %s1998_s16  }
 0x143   :  { %1994 = dma.done.wait [#allocation5], 4096  }
 0x144   :  { %1995 = vsyncadd [#allocation5], 4294963200 }
 0x145   :  { %1386 = vsyncpa [#allocation4], 1 }
 0x146   :  { %1387 = vsyncpa [#allocation7], 1 }
 0x147   :  { %1388 = vsyncpa [#allocation5], 1 }

</bundles_post_ra>
